<compile_context>
chip_gen: v6e
topology: v6e:2x2x1
jax: 0.10.0
libtpu: 0.0.40
codegen_flags: <defaults>
</compile_context>

<pallas_src>
import jax
import jax.numpy as jnp
from jax.experimental import pallas as pl
from jax.experimental.pallas import tpu as pltpu

NUM_CLASSES = 20
LANE = 128       # hidden / output feature dims padded to a full lane width
MAX_TB = 1024    # max batch tile (multiple of 16 for bf16 sublane packing)


def mlp_kernel(x_ref, w1_ref, ws_ref, bs_ref, o_ref):
    # x_ref : (TB, d_in)      f32   (cast to bf16 in-kernel)
    # w1_ref: (d_in, 128)     bf16
    # ws_ref: (3, 128, 128)   bf16  (layers 2..4, zero-padded)
    # bs_ref: (4, 128)        f32   (biases, zero-padded)
    # o_ref : (TB, 128)       bf16
    b = bs_ref[...]                                   # (4, 128) f32, stays in vregs

    x = x_ref[...].astype(jnp.bfloat16)
    h = jnp.dot(x, w1_ref[...], preferred_element_type=jnp.float32) + b[0]
    h = jnp.maximum(h, 0.0)

    h = jnp.dot(h.astype(jnp.bfloat16), ws_ref[0],
                preferred_element_type=jnp.float32) + b[1]
    h = jnp.maximum(h, 0.0)

    h = jnp.dot(h.astype(jnp.bfloat16), ws_ref[1],
                preferred_element_type=jnp.float32) + b[2]
    h = jnp.maximum(h, 0.0)

    out = jnp.dot(h.astype(jnp.bfloat16), ws_ref[2],
                  preferred_element_type=jnp.float32) + b[3]
    o_ref[...] = out.astype(o_ref.dtype)


def _round_up(n, m):
    return ((n + m - 1) // m) * m


def _pad2d(a, rows, cols):
    r, c = a.shape
    return jnp.pad(a, ((0, rows - r), (0, cols - c)))


def init_params(key, d_in, k=NUM_CLASSES):
    """Deterministic init mimicking PyTorch nn.Linear default (uniform +-1/sqrt(fan_in)).
    Weights are stored transposed relative to PyTorch: shape (in, out)."""
    dims = [d_in, 128, 64, 32, k]
    params = {}
    for i in range(4):
        fan_in, fan_out = dims[i], dims[i + 1]
        key, kw, kb = jax.random.split(key, 3)
        bound = 1.0 / jnp.sqrt(fan_in)
        params[f"w{i+1}"] = jax.random.uniform(
            kw, (fan_in, fan_out), jnp.float32, minval=-bound, maxval=bound)
        params[f"b{i+1}"] = jax.random.uniform(
            kb, (1, fan_out), jnp.float32, minval=-bound, maxval=bound)
    return params


def prepare_params(params):
    """One-time pad + cast + pack of the weights/biases for the kernel.
    Call once at init and reuse the result for every forward call."""
    d_in = params["w1"].shape[0]
    w1 = _pad2d(params["w1"], d_in, LANE).astype(jnp.bfloat16)          # (d_in, 128)
    w_stack = jnp.stack([
        _pad2d(params["w2"], LANE, LANE),
        _pad2d(params["w3"], LANE, LANE),
        _pad2d(params["w4"], LANE, LANE),
    ]).astype(jnp.bfloat16)                                             # (3, 128, 128)
    b_stack = jnp.stack([
        _pad2d(params["b1"], 1, LANE)[0],
        _pad2d(params["b2"], 1, LANE)[0],
        _pad2d(params["b3"], 1, LANE)[0],
        _pad2d(params["b4"], 1, LANE)[0],
    ]).astype(jnp.float32)                                              # (4, 128)
    return {"d_in": d_in, "k": params["w4"].shape[1],
            "w1": w1, "w_stack": w_stack, "b_stack": b_stack}


def mlp_forward(x, prepared):
    """x: (B, d_in) float32; prepared: output of prepare_params()."""
    B, d_in = x.shape
    assert d_in == prepared["d_in"]
    k = prepared["k"]

    # --- batch tiling: big tiles, but >=2 grid steps when possible (v7x megacore) --
    B16 = _round_up(B, 16)
    if B16 >= 32:
        TB = min(MAX_TB, _round_up(pl.cdiv(B16, 2), 16))
    else:
        TB = B16
    grid_b = pl.cdiv(B16, TB)
    B_pad = grid_b * TB

    # Only pad rows (never lanes, never cast) -- no-op when already aligned.
    if B_pad != B:
        x_in = jnp.pad(x, ((0, B_pad - B), (0, 0)))
    else:
        x_in = x

    w1, ws, bs = prepared["w1"], prepared["w_stack"], prepared["b_stack"]

    # --- specs: x/out tiled over batch, weights/biases resident (constant maps) ----
    x_spec = pl.BlockSpec((TB, d_in), lambda i: (i, 0))
    w1_spec = pl.BlockSpec((d_in, LANE), lambda i: (0, 0))
    ws_spec = pl.BlockSpec((3, LANE, LANE), lambda i: (0, 0, 0))
    bs_spec = pl.BlockSpec((4, LANE), lambda i: (0, 0))
    out_spec = pl.BlockSpec((TB, LANE), lambda i: (i, 0))

    flops = 2 * B_pad * (d_in * LANE + 3 * LANE * LANE)
    bytes_accessed = (B_pad * d_in * 4            # x (f32 in)
                      + d_in * LANE * 2           # w1 (bf16)
                      + 3 * LANE * LANE * 2       # packed weights (bf16)
                      + 4 * LANE * 4              # packed biases (f32)
                      + B_pad * LANE * 2)         # out (bf16)

    out_padded = pl.pallas_call(
        mlp_kernel,
        out_shape=jax.ShapeDtypeStruct((B_pad, LANE), jnp.bfloat16),
        grid=(grid_b,),
        in_specs=[x_spec, w1_spec, ws_spec, bs_spec],
        out_specs=out_spec,
        compiler_params=pltpu.CompilerParams(
            dimension_semantics=("parallel",)),
        cost_estimate=pl.CostEstimate(
            flops=int(flops), transcendentals=0,
            bytes_accessed=int(bytes_accessed)),
    )(x_in, w1, ws, bs)

    # Slice off batch/lane padding for module-equivalent (B, k) logits.
    return out_padded[:B, :k]


def mlp_reference_bf16(x, params):
    """Reference with the same bf16-in / f32-accumulate matmul contract."""
    def dot(a, w):
        return jnp.dot(a.astype(jnp.bfloat16), w.astype(jnp.bfloat16),
                       preferred_element_type=jnp.float32)
    h = jnp.maximum(dot(x, params["w1"]) + params["b1"], 0.0)
    h = jnp.maximum(dot(h, params["w2"]) + params["b2"], 0.0)
    h = jnp.maximum(dot(h, params["w3"]) + params["b3"], 0.0)
    return dot(h, params["w4"]) + params["b4"]


def mlp_reference_f32(x, params):
    h = jnp.maximum(x @ params["w1"] + params["b1"], 0.0)
    h = jnp.maximum(h @ params["w2"] + params["b2"], 0.0)
    h = jnp.maximum(h @ params["w3"] + params["b3"], 0.0)
    return h @ params["w4"] + params["b4"]


if __name__ == "__main__":
    key = jax.random.PRNGKey(0)
    B, d_in = 8, 32

    key, kx = jax.random.split(key)
    x = jax.random.normal(kx, (B, d_in), jnp.float32)
    params = init_params(key, d_in, NUM_CLASSES)
    prepared = prepare_params(params)          # one-time pad/cast/pack

    out = mlp_forward(x, prepared)
    out = jax.block_until_ready(out)

    assert out.shape == (B, NUM_CLASSES)
    out_f32 = out.astype(jnp.float32)

    # Tight check vs the bf16-in / f32-accumulate contract (output is bf16-rounded).
    ref_bf16 = mlp_reference_bf16(x, params)
    assert jnp.allclose(out_f32, ref_bf16, atol=2e-2, rtol=2e-2), \
        "mismatch vs bf16 reference"

    # Loose sanity check against the pure-f32 PyTorch-equivalent forward.
    ref_f32 = mlp_reference_f32(x, params)
    assert jnp.allclose(out_f32, ref_f32, atol=1e-1, rtol=1e-1), \
        "mismatch vs f32 reference"

    print("KERNEL_OK")
</pallas_src>

<mosaic_0001>
module attributes {stable_mosaic.version = 11 : i64} {
  func.func @mlp_kernel(%arg0: i32, %arg1: memref<16x32xf32, #tpu.memory_space<vmem>>, %arg2: memref<32x128xbf16, #tpu.memory_space<vmem>>, %arg3: memref<3x128x128xbf16, #tpu.memory_space<vmem>>, %arg4: memref<4x128xf32, #tpu.memory_space<vmem>>, %arg5: memref<16x128xbf16, #tpu.memory_space<vmem>>) attributes {dimension_semantics = [#tpu.dimension_semantics<parallel>], iteration_bounds = array<i64: 1>, scalar_prefetch = 0 : i64, scratch_operands = 0 : i64, tpu.core_type = #tpu.core_type<tc>, window_params = [{transform_indices = @transform_0, window_bounds = array<i64: 16, 32>}, {pipeline_mode = #tpu.pipeline_mode<synchronous>, transform_indices = @transform_1, window_bounds = array<i64: 32, 128>}, {pipeline_mode = #tpu.pipeline_mode<synchronous>, transform_indices = @transform_2, window_bounds = array<i64: 3, 128, 128>}, {pipeline_mode = #tpu.pipeline_mode<synchronous>, transform_indices = @transform_3, window_bounds = array<i64: 4, 128>}, {transform_indices = @transform_4, window_bounds = array<i64: 16, 128>}]} {
    %c0 = arith.constant 0 : index
    %c0_0 = arith.constant 0 : index
    %0 = vector.load %arg4[%c0, %c0_0] : memref<4x128xf32, #tpu.memory_space<vmem>>, vector<4x128xf32>
    %c0_1 = arith.constant 0 : index
    %c0_2 = arith.constant 0 : index
    %1 = vector.load %arg1[%c0_1, %c0_2] : memref<16x32xf32, #tpu.memory_space<vmem>>, vector<16x32xf32>
    %2 = arith.truncf %1 : vector<16x32xf32> to vector<16x32xbf16>
    %c0_3 = arith.constant 0 : index
    %c0_4 = arith.constant 0 : index
    %3 = vector.load %arg2[%c0_3, %c0_4] : memref<32x128xbf16, #tpu.memory_space<vmem>>, vector<32x128xbf16>
    %cst = arith.constant dense<0.000000e+00> : vector<16x128xf32>
    %4 = tpu.matmul %2, %3, %cst {dimension_numbers = #tpu.dot_dimension_numbers<[1], [0], [0], [1], [0, 0, 1, 1], [], []>} : vector<16x32xbf16>, vector<32x128xbf16>, vector<16x128xf32> -> vector<16x128xf32>
    %5 = vector.extract_strided_slice %0 {offsets = [0, 0], sizes = [1, 128], strides = [1, 1]} : vector<4x128xf32> to vector<1x128xf32>
    %6 = vector.shape_cast %5 : vector<1x128xf32> to vector<128xf32>
    %7 = vector.shape_cast %6 : vector<128xf32> to vector<1x128xf32>
    %8 = vector.broadcast %7 : vector<1x128xf32> to vector<16x128xf32>
    %9 = arith.addf %4, %8 : vector<16x128xf32>
    %cst_5 = arith.constant 0.000000e+00 : f32
    %10 = vector.broadcast %cst_5 : f32 to vector<16x128xf32>
    %11 = arith.maximumf %9, %10 : vector<16x128xf32>
    %12 = arith.truncf %11 : vector<16x128xf32> to vector<16x128xbf16>
    %c0_6 = arith.constant 0 : index
    %c0_7 = arith.constant 0 : index
    %c0_8 = arith.constant 0 : index
    %13 = vector.load %arg3[%c0_6, %c0_7, %c0_8] : memref<3x128x128xbf16, #tpu.memory_space<vmem>>, vector<1x128x128xbf16>
    %14 = vector.shape_cast %13 : vector<1x128x128xbf16> to vector<128x128xbf16>
    %cst_9 = arith.constant dense<0.000000e+00> : vector<16x128xf32>
    %15 = tpu.matmul %12, %14, %cst_9 {dimension_numbers = #tpu.dot_dimension_numbers<[1], [0], [0], [1], [0, 0, 1, 1], [], []>} : vector<16x128xbf16>, vector<128x128xbf16>, vector<16x128xf32> -> vector<16x128xf32>
    %16 = vector.extract_strided_slice %0 {offsets = [1, 0], sizes = [1, 128], strides = [1, 1]} : vector<4x128xf32> to vector<1x128xf32>
    %17 = vector.shape_cast %16 : vector<1x128xf32> to vector<128xf32>
    %18 = vector.shape_cast %17 : vector<128xf32> to vector<1x128xf32>
    %19 = vector.broadcast %18 : vector<1x128xf32> to vector<16x128xf32>
    %20 = arith.addf %15, %19 : vector<16x128xf32>
    %cst_10 = arith.constant 0.000000e+00 : f32
    %21 = vector.broadcast %cst_10 : f32 to vector<16x128xf32>
    %22 = arith.maximumf %20, %21 : vector<16x128xf32>
    %23 = arith.truncf %22 : vector<16x128xf32> to vector<16x128xbf16>
    %c1 = arith.constant 1 : index
    %c0_11 = arith.constant 0 : index
    %c0_12 = arith.constant 0 : index
    %24 = vector.load %arg3[%c1, %c0_11, %c0_12] : memref<3x128x128xbf16, #tpu.memory_space<vmem>>, vector<1x128x128xbf16>
    %25 = vector.shape_cast %24 : vector<1x128x128xbf16> to vector<128x128xbf16>
    %cst_13 = arith.constant dense<0.000000e+00> : vector<16x128xf32>
    %26 = tpu.matmul %23, %25, %cst_13 {dimension_numbers = #tpu.dot_dimension_numbers<[1], [0], [0], [1], [0, 0, 1, 1], [], []>} : vector<16x128xbf16>, vector<128x128xbf16>, vector<16x128xf32> -> vector<16x128xf32>
    %27 = vector.extract_strided_slice %0 {offsets = [2, 0], sizes = [1, 128], strides = [1, 1]} : vector<4x128xf32> to vector<1x128xf32>
    %28 = vector.shape_cast %27 : vector<1x128xf32> to vector<128xf32>
    %29 = vector.shape_cast %28 : vector<128xf32> to vector<1x128xf32>
    %30 = vector.broadcast %29 : vector<1x128xf32> to vector<16x128xf32>
    %31 = arith.addf %26, %30 : vector<16x128xf32>
    %cst_14 = arith.constant 0.000000e+00 : f32
    %32 = vector.broadcast %cst_14 : f32 to vector<16x128xf32>
    %33 = arith.maximumf %31, %32 : vector<16x128xf32>
    %34 = arith.truncf %33 : vector<16x128xf32> to vector<16x128xbf16>
    %c2 = arith.constant 2 : index
    %c0_15 = arith.constant 0 : index
    %c0_16 = arith.constant 0 : index
    %35 = vector.load %arg3[%c2, %c0_15, %c0_16] : memref<3x128x128xbf16, #tpu.memory_space<vmem>>, vector<1x128x128xbf16>
    %36 = vector.shape_cast %35 : vector<1x128x128xbf16> to vector<128x128xbf16>
    %cst_17 = arith.constant dense<0.000000e+00> : vector<16x128xf32>
    %37 = tpu.matmul %34, %36, %cst_17 {dimension_numbers = #tpu.dot_dimension_numbers<[1], [0], [0], [1], [0, 0, 1, 1], [], []>} : vector<16x128xbf16>, vector<128x128xbf16>, vector<16x128xf32> -> vector<16x128xf32>
    %38 = vector.extract_strided_slice %0 {offsets = [3, 0], sizes = [1, 128], strides = [1, 1]} : vector<4x128xf32> to vector<1x128xf32>
    %39 = vector.shape_cast %38 : vector<1x128xf32> to vector<128xf32>
    %40 = vector.shape_cast %39 : vector<128xf32> to vector<1x128xf32>
    %41 = vector.broadcast %40 : vector<1x128xf32> to vector<16x128xf32>
    %42 = arith.addf %37, %41 : vector<16x128xf32>
    %43 = arith.truncf %42 : vector<16x128xf32> to vector<16x128xbf16>
    %c0_18 = arith.constant 0 : index
    %c0_19 = arith.constant 0 : index
    %44 = vector.load %arg5[%c0_18, %c0_19] : memref<16x128xbf16, #tpu.memory_space<vmem>>, vector<16x128xbf16>
    tpu.vector_store %arg5[%c0_18, %c0_19], %43 {strides = array<i32>} : memref<16x128xbf16, #tpu.memory_space<vmem>>, vector<16x128xbf16>,
    return
  }
  func.func @transform_0(%arg0: i32) -> (i32, i32) {
    %c0_i32 = arith.constant 0 : i32
    %c0_i32_0 = arith.constant 0 : i32
    return %arg0, %c0_i32 : i32, i32
  }
  func.func @transform_1(%arg0: i32) -> (i32, i32) {
    %c0_i32 = arith.constant 0 : i32
    %c0_i32_0 = arith.constant 0 : i32
    %c0_i32_1 = arith.constant 0 : i32
    return %c0_i32, %c0_i32_0 : i32, i32
  }
  func.func @transform_2(%arg0: i32) -> (i32, i32, i32) {
    %c0_i32 = arith.constant 0 : i32
    %c0_i32_0 = arith.constant 0 : i32
    %c0_i32_1 = arith.constant 0 : i32
    %c0_i32_2 = arith.constant 0 : i32
    return %c0_i32, %c0_i32_0, %c0_i32_1 : i32, i32, i32
  }
  func.func @transform_3(%arg0: i32) -> (i32, i32) {
    %c0_i32 = arith.constant 0 : i32
    %c0_i32_0 = arith.constant 0 : i32
    %c0_i32_1 = arith.constant 0 : i32
    return %c0_i32, %c0_i32_0 : i32, i32
  }
  func.func @transform_4(%arg0: i32) -> (i32, i32) {
    %c0_i32 = arith.constant 0 : i32
    %c0_i32_0 = arith.constant 0 : i32
    return %arg0, %c0_i32 : i32, i32
  }
}

</mosaic_0001>

<bundles_post_ra>
// kernel: tpu_custom_call.1
= control target key start
LH: loop header
LB: loop body
LE: loop exit
PB: predicated region body
PF: predicated region fallthrough
CT: control target
= control target key end

     0   :  { %9 = vsyncpa [#allocation3], 0  ;;  %s856_s0 = inlined_call_operand.hbm [shape: f32[16,32], index: 0, kind: input, shape index: {}]   ;;  %s857_s1 = inlined_call_operand.hbm [shape: bf16[32,128], index: 1, kind: input, shape index: {}]   ;;  %s858_s2 = inlined_call_operand.hbm [shape: bf16[3,128,128], index: 2, kind: input, shape index: {}]   ;;  %s859_s3 = inlined_call_operand.vmem [shape: f32[4,128], index: 3, kind: input, shape index: {}]   ;;  %s860_s4 = inlined_call_operand.hbm [shape: bf16[16,128], index: 4, kind: output, shape index: {}]  }
   0x1   :  { %10 = vsyncpa [#allocation6], 0 }
   0x2   :  { %11 = vsyncpa [#allocation4], 0  ;;  %s751_s15 = smov [#allocation5]  }
   0x3   :  { %s29_s16 = sshll.u32 %s751_s15, 4  ;;  %s30_s16 = int_to_ptr.vmem [resolvable:$true] %s29_s16 }
   0x4   :  { %s673_s17 = scalar_lea.vmem %s30_s16, 256  ;;  %p678_p1 = scmp.lt.s32.totalorder %s30_s16, %s30_s16 }
   0x5   :  { %p674_p0 = scmp.ne.s32.totalorder %s30_s16, %s673_s17  ;;  %p679_p2 = scmp.lt.s32.totalorder %s673_s17, %s673_s17 }
   0x7   :  { %p680_p3 = por %p679_p2, %p678_p1 }
   0x9   :  { %p681_p4 = pnand %p680_p3, %p674_p0 }
   0xb   :  { %684 = shalt.err (!%p681_p4)
}
   0xc   :  { %s752_s18 = smov 64   ;;  %s753_s19 = smov 4  }
   0xd   :  { %35 = dma.hbm_to_vmem [thread:$0]  %s857_s1, 256, %s30_s16, [#allocation6], %s752_s18, %s752_s18, %s753_s19  }
   0xe   :  { %s754_s22 = smov [#allocation2]  }
   0xf   :  { %s17_s23 = sshll.u32 %s754_s22, 4  ;;  %s18_s23 = int_to_ptr.vmem [resolvable:$true] %s17_s23 }
  0x10   :  { %s693_s24 = scalar_lea.vmem %s18_s23, 256  ;;  %p698_p6 = scmp.lt.s32.totalorder %s18_s23, %s18_s23 }
  0x11   :  { %p694_p5 = scmp.ne.s32.totalorder %s18_s23, %s693_s24  ;;  %p699_p7 = scmp.lt.s32.totalorder %s693_s24, %s693_s24 }
  0x13   :  { %p700_p8 = por %p699_p7, %p698_p6 }
  0x15   :  { %p701_p9 = pnand %p700_p8, %p694_p5 }
  0x17   :  { %704 = shalt.err (!%p701_p9)
}
  0x18   :  { %s755_s25 = smov 128   ;;  %s756_s26 = smov 8  }
  0x19   :  { %23 = dma.hbm_to_vmem [thread:$0]  %s856_s0, 256, %s18_s23, [#allocation3], %s755_s25, %s755_s25, %s756_s26  }
  0x1a   :  { %s757_s29 = smov [#allocation7]  }
  0x1b   :  { %s41_s30 = sshll.u32 %s757_s29, 4  ;;  %s42_s30 = int_to_ptr.vmem [resolvable:$true] %s41_s30 }
  0x1c   :  { %s713_s1 = scalar_lea.vmem %s42_s30, 3072  ;;  %p718_p11 = scmp.lt.s32.totalorder %s42_s30, %s42_s30 }
  0x1d   :  { %p714_p10 = scmp.ne.s32.totalorder %s42_s30, %s713_s1  ;;  %p719_p12 = scmp.lt.s32.totalorder %s713_s1, %s713_s1 }
  0x1f   :  { %p720_p13 = por %p719_p12, %p718_p11 }
  0x21   :  { %p721_p0 = pnand %p720_p13, %p714_p10 }
  0x23   :  { %724 = shalt.err (!%p721_p0)
}
  0x24   :  { %47 = dma.hbm_to_vmem [thread:$0]  %s858_s2, 3072, %s42_s30, [#allocation6], %s752_s18, %s752_s18, %s753_s19  }
  0x25   :  { %745 = dma.done.wait [#allocation3], 256  }
  0x26   :  { %746 = vsyncadd [#allocation3], 4294967040 }
  0x27   :  { %747 = dma.done.wait [#allocation6], 3328  }
  0x28   :  { %748 = vsyncadd [#allocation6], 4294963968  ;;  %v758_v0 = vmov 0.0   ;;  %vm759_vm0 = vmmov 0   ;;  %v639_v1 = vld [vmem:[#allocation5 + $0x8] sm:$0xff]   ;;  %v640_v2 = vld [vmem:[#allocation5] sm:$0xff]   ;;  %v68_v19 = vlaneseq }
  0x29   :  { %561 = vmatprep.subr.bf16.mxu0 %v758_v0  ;;  %565 = vmatprep.mubr.msk.bf16.mxu0 %vm759_vm0, %v758_v0  ;;  %v61_v3 = vld [vmem:[#allocation2] sm:$0xff]  ;;  %v62_v4 = vld [vmem:[#allocation2 + $0x8] sm:$0xff]  ;;  %v641_v5 = vld [vmem:[#allocation7 + $0x38] sm:$0xff]   ;;  %vm84_vm1 = vcmask 261120  }
  0x2a   :  { %569 = vmatprep.subr.bf16.mxu1 %v758_v0  ;;  %585 = vmatprep.mubr.msk.bf16.mxu1 %vm759_vm0, %v758_v0  ;;  %v63_v6 = vpack.c.bf16 %v62_v4, %v61_v3  ;;  %v642_v7 = vld [vmem:[#allocation7 + $0x30] sm:$0xff]   ;;  %v643_v8 = vld [vmem:[#allocation7 + $0x28] sm:$0xff]   ;;  %v644_v9 = vld [vmem:[#allocation7 + $0x20] sm:$0xff]   ;;  %v824_v20 = vshrl.u32 %v68_v19, 7 }
  0x2b   :  { %562 = vmatpush3.bf16.msra.mxu0 %v639_v1  ;;  %570 = vmatpush3.bf16.msra.mxu1 %v641_v5  ;;  %v645_v10 = vld [vmem:[#allocation7 + $0x18] sm:$0xff]   ;;  %v646_v11 = vld [vmem:[#allocation7 + $0x10] sm:$0xff]   ;;  %v647_v12 = vld [vmem:[#allocation7 + $0x8] sm:$0xff]  }
  0x2c   :  { %563 = vmatprep.subr.bf16.mxu0 %v758_v0  ;;  %571 = vmatprep.subr.bf16.mxu1 %v758_v0  ;;  %v648_v13 = vld [vmem:[#allocation7] sm:$0xff]   ;;  %v649_v14 = vld [vmem:[#allocation7 + $0x78] sm:$0xff]   ;;  %v650_v15 = vld [vmem:[#allocation7 + $0x70] sm:$0xff]   ;;  %v70_v21 = vsub.s32 0, %v824_v20  ;;  %v150_v41 = vsub.s32 1, %v824_v20  ;;  %v263_v55 = vsub.s32 2, %v824_v20 }
  0x2d   :  { %v651_v16 = vld [vmem:[#allocation7 + $0x68] sm:$0xff]   ;;  %v652_v17 = vld [vmem:[#allocation7 + $0x60] sm:$0xff]   ;;  %v653_v18 = vld [vmem:[#allocation7 + $0x58] sm:$0xff]   ;;  %v376_v3 = vsub.s32 3, %v824_v20 }
  0x2e   :  { %v830_v22 = vld [vmem:[%s859_s3] sm:$0xf]  ;;  %v654_v33 = vld [vmem:[#allocation7 + $0x50] sm:$0xff]   ;;  %v655_v34 = vld [vmem:[#allocation7 + $0x48] sm:$0xff]   ;;  %s760_s3 = smov [#allocation8]  }
  0x2f   :  { %564 = vmatpush3.bf16.msra.mxu0 %v640_v2  ;;  %572 = vmatpush3.bf16.msra.mxu1 %v642_v7  ;;  %v71_v23 = vrot.slane %v830_v22, %v70_v21  ;;  %v656_v35 = vld [vmem:[#allocation7 + $0x40] sm:$0xff]   ;;  %v657_v36 = vld [vmem:[#allocation7 + $0xb8] sm:$0xff]   ;;  %v658_v37 = vld [vmem:[#allocation7 + $0xb0] sm:$0xff]   ;;  %v151_v42 = vrot.slane %v830_v22, %v150_v41  ;;  %v264_v56 = vrot.slane %v830_v22, %v263_v55  ;;  %s482_s7 = sshll.u32 %s760_s3, 4  ;;  %s483_s7 = int_to_ptr.vmem [resolvable:$true] %s482_s7 }
  0x30   :  { %589 = vmatprep.subr.bf16.mxu0 %v758_v0  ;;  %573 = vmatprep.subr.bf16.mxu1 %v758_v0  ;;  %v659_v38 = vld [vmem:[#allocation7 + $0xa8] sm:$0xff]   ;;  %v660_v39 = vld [vmem:[#allocation7 + $0xa0] sm:$0xff]   ;;  %v661_v40 = vld [vmem:[#allocation7 + $0x98] sm:$0xff]   ;;  %s725_s8 = scalar_lea.vmem %s483_s7, 128  ;;  %p730_p2 = scmp.lt.s32.totalorder %s483_s7, %s483_s7 }
  0x31   :  { %v662_v52 = vld [vmem:[#allocation7 + $0x90] sm:$0xff]   ;;  %v663_v53 = vld [vmem:[#allocation7 + $0x88] sm:$0xff]   ;;  %v664_v54 = vld [vmem:[#allocation7 + $0x80] sm:$0xff]   ;;  %p726_p1 = scmp.ne.s32.totalorder %s483_s7, %s725_s8  ;;  %p731_p3 = scmp.lt.s32.totalorder %s725_s8, %s725_s8 }
  0x32   :  { %566 = vmatmul.mubr.msk.bf16.vlgmr.msra.gmra.mxu0 %vm84_vm1, %v63_v6 }
  0x33   :  { %605 = vmatprep.mubr.msk.bf16.mxu0 %vm759_vm0, %v758_v0  ;;  %574 = vmatpush3.bf16.msra.mxu1 %v643_v8  ;;  %p732_p4 = por %p731_p3, %p730_p2 }
  0x34   :  { %575 = vmatprep.subr.bf16.mxu1 %v758_v0  ;;  %590 = vmatpush3.bf16.msra.mxu0 %v649_v14 }
  0x35   :  { %591 = vmatprep.subr.bf16.mxu0 %v758_v0  ;;  %p733_p5 = pnand %p732_p4, %p726_p1 }
  0x37   :  { %576 = vmatpush3.bf16.msra.mxu1 %v644_v9 }
  0x38   :  { %577 = vmatprep.subr.bf16.mxu1 %v758_v0  ;;  %592 = vmatpush3.bf16.msra.mxu0 %v650_v15 }
  0x39   :  { %593 = vmatprep.subr.bf16.mxu0 %v758_v0 }
  0x3b   :  { %578 = vmatpush3.bf16.msra.mxu1 %v645_v10 }
  0x3c   :  { %579 = vmatprep.subr.bf16.mxu1 %v758_v0  ;;  %594 = vmatpush3.bf16.msra.mxu0 %v651_v16 }
  0x3d   :  { %595 = vmatprep.subr.bf16.mxu0 %v758_v0 }
  0x3f   :  { %580 = vmatpush3.bf16.msra.mxu1 %v646_v11 }
  0x40   :  { %581 = vmatprep.subr.bf16.mxu1 %v758_v0  ;;  %596 = vmatpush3.bf16.msra.mxu0 %v652_v17 }
  0x41   :  { %597 = vmatprep.subr.bf16.mxu0 %v758_v0 }
  0x43   :  { %582 = vmatpush3.bf16.msra.mxu1 %v647_v12 }
  0x44   :  { %583 = vmatprep.subr.bf16.mxu1 %v758_v0  ;;  %598 = vmatpush3.bf16.msra.mxu0 %v653_v18 }
  0x45   :  { %599 = vmatprep.subr.bf16.mxu0 %v758_v0 }
  0x47   :  { %584 = vmatpush3.bf16.msra.mxu1 %v648_v13 }
  0x48   :  { %609 = vmatprep.subr.bf16.mxu1 %v758_v0  ;;  %600 = vmatpush3.bf16.msra.mxu0 %v654_v33 }
  0x49   :  { %601 = vmatprep.subr.bf16.mxu0 %v758_v0 }
  0x4c   :  { %602 = vmatpush3.bf16.msra.mxu0 %v655_v34 }
  0x4d   :  { %603 = vmatprep.subr.bf16.mxu0 %v758_v0 }
  0x50   :  { %604 = vmatpush3.bf16.msra.mxu0 %v656_v35 }
  0xf2   :  { %v122_v24 = vpop.f32.mrf.mxu0 }
  0xf3   :  { %v123_v26 = vadd.f32 %v122_v24, %v71_v23 }
  0xf4   :  { %v567_v25 = vpop.f32.mrf.mxu0 }
  0xf5   :  { %v129_v30 = vmax.f32 %v123_v26, 0.0 }
  0xf6   :  { %v125_v27 = vpop.f32.mrf.mxu0 }
  0xf7   :  { %v126_v28 = vadd.f32 %v125_v27, %v71_v23 }
  0xf8   :  { %v568_v29 = vpop.f32.mrf.mxu0 }
  0xf9   :  { %v130_v31 = vmax.f32 %v126_v28, 0.0 }
  0xfb   :  { %v131_v32 = vpack.c.bf16 %v130_v31, %v129_v30 }
  0xfd   :  { %586 = vmatmul.mubr.bf16.vlgmr.msra.gmra.mxu1 %v131_v32 }
  0xfe   :  { %625 = vmatprep.mubr.msk.bf16.mxu1 %vm759_vm0, %v758_v0  ;;  %610 = vmatpush3.bf16.msra.mxu1 %v657_v36 }
  0xff   :  { %611 = vmatprep.subr.bf16.mxu1 %v758_v0 }
 0x102   :  { %612 = vmatpush3.bf16.msra.mxu1 %v658_v37 }
 0x103   :  { %613 = vmatprep.subr.bf16.mxu1 %v758_v0 }
 0x106   :  { %614 = vmatpush3.bf16.msra.mxu1 %v659_v38 }
 0x107   :  { %615 = vmatprep.subr.bf16.mxu1 %v758_v0 }
 0x10a   :  { %616 = vmatpush3.bf16.msra.mxu1 %v660_v39 }
 0x10b   :  { %617 = vmatprep.subr.bf16.mxu1 %v758_v0 }
 0x10e   :  { %618 = vmatpush3.bf16.msra.mxu1 %v661_v40 }
 0x10f   :  { %619 = vmatprep.subr.bf16.mxu1 %v758_v0 }
 0x112   :  { %620 = vmatpush3.bf16.msra.mxu1 %v662_v52 }
 0x113   :  { %621 = vmatprep.subr.bf16.mxu1 %v758_v0 }
 0x116   :  { %622 = vmatpush3.bf16.msra.mxu1 %v663_v53 }
 0x117   :  { %623 = vmatprep.subr.bf16.mxu1 %v758_v0  ;;  %v377_v0 = vrot.slane %v830_v22, %v376_v3 }
 0x11a   :  { %624 = vmatpush3.bf16.msra.mxu1 %v664_v54 }
 0x1bd   :  { %v234_v43 = vpop.f32.mrf.mxu1 }
 0x1be   :  { %v235_v45 = vadd.f32 %v234_v43, %v151_v42 }
 0x1bf   :  { %v587_v44 = vpop.f32.mrf.mxu1 }
 0x1c0   :  { %v241_v49 = vmax.f32 %v235_v45, 0.0 }
 0x1c1   :  { %v237_v46 = vpop.f32.mrf.mxu1 }
 0x1c2   :  { %v238_v47 = vadd.f32 %v237_v46, %v151_v42 }
 0x1c3   :  { %v588_v48 = vpop.f32.mrf.mxu1 }
 0x1c4   :  { %v242_v50 = vmax.f32 %v238_v47, 0.0 }
 0x1c6   :  { %v243_v51 = vpack.c.bf16 %v242_v50, %v241_v49 }
 0x1c8   :  { %606 = vmatmul.mubr.bf16.vlgmr.msra.gmra.mxu0 %v243_v51 }
 0x288   :  { %v347_v57 = vpop.f32.mrf.mxu0 }
 0x289   :  { %v348_v59 = vadd.f32 %v347_v57, %v264_v56 }
 0x28a   :  { %v607_v58 = vpop.f32.mrf.mxu0 }
 0x28b   :  { %v354_v63 = vmax.f32 %v348_v59, 0.0 }
 0x28c   :  { %v350_v60 = vpop.f32.mrf.mxu0 }
 0x28d   :  { %v351_v61 = vadd.f32 %v350_v60, %v264_v56 }
 0x28e   :  { %v608_v62 = vpop.f32.mrf.mxu0 }
 0x28f   :  { %v355_v1 = vmax.f32 %v351_v61, 0.0 }
 0x291   :  { %v356_v2 = vpack.c.bf16 %v355_v1, %v354_v63 }
 0x293   :  { %626 = vmatmul.mubr.bf16.vlgmr.msra.gmra.mxu1 %v356_v2 }
 0x353   :  { %v460_v4 = vpop.f32.mrf.mxu1 }
 0x354   :  { %v461_v7 = vadd.f32 %v460_v4, %v377_v0 }
 0x355   :  { %v627_v5 = vpop.f32.mrf.mxu1 }
 0x357   :  { %v463_v6 = vpop.f32.mrf.mxu1 }
 0x358   :  { %v464_v8 = vadd.f32 %v463_v6, %v377_v0 }
 0x359   :  { %v628_v9 = vpop.f32.mrf.mxu1 }
 0x35a   :  { %v529_v10 = vpack.c.bf16 %v464_v8, %v461_v7 }
 0x35c   :  { %530 = vst [vmem:[#allocation8] sm:$0xff] %v529_v10  }
 0x35d   :  { %736 = shalt.err (!%p733_p5)
}
 0x35e   :  { %488 = dma.vmem_to_hbm [thread:$0]  %s483_s7, 128, %s860_s4, [#allocation4], %s752_s18, %s752_s18, %s753_s19  }
 0x35f   :  { %749 = dma.done.wait [#allocation4], 128  }
 0x360   :  { %750 = vsyncadd [#allocation4], 4294967168 }
 0x361   :  { %492 = vsyncpa [#allocation3], 1 }
 0x362   :  { %493 = vsyncpa [#allocation6], 1 }
 0x363   :  { %494 = vsyncpa [#allocation4], 1 }

</bundles_post_ra>
